<compile_context>
chip_gen: v7x
topology: tpu7x:2x2x1
jax: 0.10.0
libtpu: 0.0.40
codegen_flags: <defaults>
</compile_context>

<pallas_src>
import jax
import jax.numpy as jnp
from jax import lax
from jax.experimental import pallas as pl
from jax.experimental.pallas import tpu as pltpu

LANE = 128


def _attention_kernel(h_ref, w_ref, b_ref, o_ref):
    # h_ref : (M, H)    flattened activations, M = batch * sent_len
    # w_ref : (Lp, H)   lane-padded linear weight (PyTorch layout, y = x @ W.T)
    # b_ref : (M, Lp)   f32 additive mask bias (0 = keep, -inf = masked/padded)
    # o_ref : (M, L)    softmax attention weights (real columns only)
    L = o_ref.shape[1]

    # Linear (no bias): trans-B contraction over H — no XLU transpose, MXU
    # sees one (M, H) x (Lp, H)^T matmul with a full 128-wide N dimension.
    scores = lax.dot_general(
        h_ref[...], w_ref[...],
        dimension_numbers=(((1,), (1,)), ((), ())),
        preferred_element_type=jnp.float32,
    )                                                    # (M, Lp)

    # masked_fill_(mask, -inf): a single VPU add of the precomputed bias.
    scores = scores + b_ref[...]

    # Numerically stable softmax over the lane dim. Masked / padded columns are
    # -inf -> exp() == 0, so they never pollute the denominator.
    # TODO(synk): a fully-masked row yields NaN (same as the PyTorch module);
    # guard the denominator if such rows can occur in production.
    row_max = jnp.max(scores, axis=-1, keepdims=True)    # (M, 1)
    e = jnp.exp(scores - row_max)                        # EUP
    denom = jnp.sum(e, axis=-1, keepdims=True)           # XLU reduce
    probs = e * pl.reciprocal(denom, approx=False)       # EUP reciprocal (exact)

    # Store only the L real columns (small masked store; avoids a post-call
    # slice HLO and an extra HBM round-trip of the padded output).
    o_ref[...] = probs[:, :L]


def make_attention_operands(weight, mask, sent_len):
    """One-time setup (parameter init / batch setup) — hoisted out of the
    per-forward hot path.

    weight : (L, H) f32   nn.Linear(hidden_dim, MAX_LENGTH, bias=False).weight
    mask   : (B, L) bool/int, nonzero positions are masked with -inf
    returns (w_pad : (Lp, H) f32, bias : (B*sent_len, Lp) f32)
    """
    L, H = weight.shape
    B = mask.shape[0]
    Lp = ((L + LANE - 1) // LANE) * LANE

    # Zero-pad the score dim to a lane-dense multiple of 128 (fills the MXU N
    # dimension and keeps stores/softmax vregs unmasked inside the kernel).
    w_pad = jnp.zeros((Lp, H), dtype=weight.dtype).at[:L, :].set(weight)

    # Additive bias: -inf on masked real columns and on all padded columns,
    # pre-broadcast over sent_len so the kernel does one elementwise add.
    bias_bl = jnp.where(mask != 0, -jnp.inf, 0.0).astype(jnp.float32)        # (B, L)
    bias = jnp.full((B, Lp), -jnp.inf, jnp.float32).at[:, :L].set(bias_bl)   # (B, Lp)
    bias = jnp.broadcast_to(bias[:, None, :], (B, sent_len, Lp))
    return w_pad, bias.reshape(B * sent_len, Lp)


def attention_forward(h_t, w_pad, bias, max_length):
    """Per-call hot path: metadata reshapes + one pallas_call, nothing else.

    h_t : (B, S, H) f32 -> (B, S, max_length) f32 attention weights.
    """
    B, S, H = h_t.shape
    Lp = w_pad.shape[0]
    M = B * S
    assert bias.shape == (M, Lp)

    h2 = h_t.reshape(M, H)                       # pure-metadata reshape
    out2 = pl.pallas_call(
        _attention_kernel,
        out_shape=jax.ShapeDtypeStruct((M, max_length), jnp.float32),
        # No grid: the whole (tiny) problem lives in VMEM in one invocation,
        # avoiding per-grid-step overhead. All block shapes equal the full
        # array shapes, so the (8,128) divisibility rule is satisfied.
        in_specs=[
            pl.BlockSpec((M, H), lambda: (0, 0)),        # activations
            pl.BlockSpec((Lp, H), lambda: (0, 0)),       # padded weight
            pl.BlockSpec((M, Lp), lambda: (0, 0)),       # additive mask bias
        ],
        out_specs=pl.BlockSpec((M, max_length), lambda: (0, 0)),
    )(h2, w_pad, bias)
    return out2.reshape(B, S, max_length)        # pure-metadata reshape


def _reference(h_t, weight, mask):
    scores = jnp.einsum("bsh,lh->bsl", h_t, weight)
    scores = jnp.where(mask[:, None, :] != 0, -jnp.inf, scores)
    return jax.nn.softmax(scores, axis=-1)


if __name__ == "__main__":
    B, S, H = 2, 8, 32          # batch, sent_len, hidden_dim
    MAX_LENGTH = 16             # config['model']['MAX_LENGTH']

    key = jax.random.PRNGKey(0)
    k_h, k_w, k_m = jax.random.split(key, 3)

    h_t = jax.random.normal(k_h, (B, S, H), dtype=jnp.float32)
    # init_weights(): uniform(-0.1, 0.1)
    weight = jax.random.uniform(k_w, (MAX_LENGTH, H),
                                minval=-0.1, maxval=0.1, dtype=jnp.float32)
    # Boolean pad mask -> int32 (nonzero == masked). Keep at least one
    # unmasked position per row so softmax is well-defined.
    mask_bool = jax.random.bernoulli(k_m, p=0.3, shape=(B, MAX_LENGTH))
    mask_bool = mask_bool.at[:, 0].set(False)
    mask = mask_bool.astype(jnp.int32)

    # One-time setup, outside the per-call hot path.
    w_pad, bias = make_attention_operands(weight, mask, S)

    out = attention_forward(h_t, w_pad, bias, MAX_LENGTH)
    out = jax.block_until_ready(out)

    ref = _reference(h_t, weight, mask)
    assert out.shape == (B, S, MAX_LENGTH)
    assert jnp.allclose(out, ref, atol=1e-5, rtol=1e-5), "mismatch vs reference"

    print("KERNEL_OK")
</pallas_src>

<mosaic_0001>
module attributes {stable_mosaic.version = 11 : i64} {
  func.func @_attention_kernel(%arg0: memref<16x32xf32, #tpu.memory_space<vmem>>, %arg1: memref<128x32xf32, #tpu.memory_space<vmem>>, %arg2: memref<16x128xf32, #tpu.memory_space<vmem>>, %arg3: memref<16x16xf32, #tpu.memory_space<vmem>>) attributes {dimension_semantics = [], scalar_prefetch = 0 : i64, scratch_operands = 0 : i64, tpu.core_type = #tpu.core_type<tc>} {
    %c0 = arith.constant 0 : index
    %c0_0 = arith.constant 0 : index
    %0 = vector.load %arg0[%c0, %c0_0] : memref<16x32xf32, #tpu.memory_space<vmem>>, vector<16x32xf32>
    %c0_1 = arith.constant 0 : index
    %c0_2 = arith.constant 0 : index
    %1 = vector.load %arg1[%c0_1, %c0_2] : memref<128x32xf32, #tpu.memory_space<vmem>>, vector<128x32xf32>
    %cst = arith.constant dense<0.000000e+00> : vector<16x128xf32>
    %2 = tpu.matmul %0, %1, %cst {dimension_numbers = #tpu.dot_dimension_numbers<[1], [1], [0], [0], [0, 0, 1, 0], [], []>} : vector<16x32xf32>, vector<128x32xf32>, vector<16x128xf32> -> vector<16x128xf32>
    %c0_3 = arith.constant 0 : index
    %c0_4 = arith.constant 0 : index
    %3 = vector.load %arg2[%c0_3, %c0_4] : memref<16x128xf32, #tpu.memory_space<vmem>>, vector<16x128xf32>
    %4 = arith.addf %2, %3 : vector<16x128xf32>
    %cst_5 = arith.constant dense<0xFF800000> : vector<16xf32>
    %5 = vector.multi_reduction <maximumf>, %4, %cst_5 [1] : vector<16x128xf32> to vector<16xf32>
    %6 = vector.shape_cast %5 : vector<16xf32> to vector<16x1xf32>
    %7 = vector.broadcast %6 : vector<16x1xf32> to vector<16x128xf32>
    %8 = arith.subf %4, %7 : vector<16x128xf32>
    %9 = math.exp %8 : vector<16x128xf32>
    %cst_6 = arith.constant dense<0.000000e+00> : vector<16xf32>
    %10 = vector.multi_reduction <add>, %9, %cst_6 [1] : vector<16x128xf32> to vector<16xf32>
    %11 = vector.shape_cast %10 : vector<16xf32> to vector<16x1xf32>
    %12 = tpu.reciprocal %11 : vector<16x1xf32> -> vector<16x1xf32>
    %13 = vector.broadcast %12 : vector<16x1xf32> to vector<16x128xf32>
    %14 = arith.mulf %9, %13 : vector<16x128xf32>
    %15 = vector.extract_strided_slice %14 {offsets = [0, 0], sizes = [16, 16], strides = [1, 1]} : vector<16x128xf32> to vector<16x16xf32>
    %c0_7 = arith.constant 0 : index
    %c0_8 = arith.constant 0 : index
    %16 = vector.load %arg3[%c0_7, %c0_8] : memref<16x16xf32, #tpu.memory_space<vmem>>, vector<16x16xf32>
    tpu.vector_store %arg3[%c0_7, %c0_8], %15 {strides = array<i32>} : memref<16x16xf32, #tpu.memory_space<vmem>>, vector<16x16xf32>,
    return
  }
}

</mosaic_0001>

<bundles_post_ra>
// kernel: tpu_custom_call.1
= control target key start
LH: loop header
LB: loop body
LE: loop exit
PB: predicated region body
PF: predicated region fallthrough
CT: control target
= control target key end

     0   :  { %vm35_vm0 = vcmask 261120   ;;  %s491_s0 = inlined_call_operand.vmem [shape: f32[16,32], index: 0, kind: input, shape index: {}]   ;;  %s492_s1 = inlined_call_operand.vmem [shape: f32[128,32], index: 1, kind: input, shape index: {}]   ;;  %s493_s2 = inlined_call_operand.vmem [shape: f32[16,128], index: 2, kind: input, shape index: {}]   ;;  %s494_s3 = inlined_call_operand.hbm [shape: f32[16,16], index: 3, kind: output, shape index: {}]  }
   0x1   :  { %v17_v0 = vld [vmem:[%s492_s1] sm:$0xff]  ;;  %v18_v1 = vld [vmem:[%s492_s1 + $0x8] sm:$0xff]  ;;  %v19_v2 = vld [vmem:[%s492_s1 + $0x10] sm:$0xff] }
   0x2   :  { %v273_v3 = vpack.c.bf16 %v18_v1, %v17_v0  ;;  %vm390_vm1 = vmpackc.low %vm35_vm0, %vm35_vm0  ;;  %v20_v5 = vld [vmem:[%s492_s1 + $0x18] sm:$0xff]  ;;  %v15_v7 = vld [vmem:[%s491_s0] sm:$0xff] }
   0x3   :  { %v279_v6 = vpack.c.bf16 %v20_v5, %v19_v2  ;;  %v21_v8 = vld [vmem:[%s492_s1 + $0x20] sm:$0xff]  ;;  %v22_v9 = vld [vmem:[%s492_s1 + $0x28] sm:$0xff]  ;;  %270 = vmatprep.mubr.msk.f32.mxu0 %vm35_vm0, %v15_v7 }
   0x4   :  { %275 = vmatprep.subr.msk.bf16.mxu0 %vm390_vm1, %v273_v3 }
   0x5   :  { %278 = vmatpush3.bf16.xpose.msk.msra.mxu0 %vm390_vm1, %v273_v3 }
   0x6   :  { %281 = vmatprep.subr.msk.bf16.mxu0 %vm390_vm1, %v279_v6 }
   0x7   :  { %8 = vsyncpa [#allocation3], 0  ;;  %v285_v10 = vpack.c.bf16 %v22_v9, %v21_v8  ;;  %v23_v11 = vld [vmem:[%s492_s1 + $0x30] sm:$0xff]  ;;  %v24_v12 = vld [vmem:[%s492_s1 + $0x38] sm:$0xff]  ;;  %vm183_vm2 = vcmask 130048  }
   0x8   :  { %v291_v13 = vpack.c.bf16 %v24_v12, %v23_v11  ;;  %v25_v14 = vld [vmem:[%s492_s1 + $0x40] sm:$0xff]  ;;  %v26_v15 = vld [vmem:[%s492_s1 + $0x48] sm:$0xff]  ;;  %v27_v17 = vld [vmem:[%s492_s1 + $0x50] sm:$0xff] }
   0x9   :  { %v297_v16 = vpack.c.bf16 %v26_v15, %v25_v14  ;;  %v28_v18 = vld [vmem:[%s492_s1 + $0x58] sm:$0xff]  ;;  %v29_v20 = vld [vmem:[%s492_s1 + $0x60] sm:$0xff]  ;;  %v30_v21 = vld [vmem:[%s492_s1 + $0x68] sm:$0xff] }
   0xa   :  { %v303_v19 = vpack.c.bf16 %v28_v18, %v27_v17  ;;  %v309_v22 = vpack.c.bf16 %v30_v21, %v29_v20  ;;  %v31_v23 = vld [vmem:[%s492_s1 + $0x70] sm:$0xff]  ;;  %v32_v24 = vld [vmem:[%s492_s1 + $0x78] sm:$0xff]  ;;  %v16_v26 = vld [vmem:[%s491_s0 + $0x8] sm:$0xff]  ;;  %s356_s0 = smov [#allocation2]  }
   0xb   :  { %v315_v25 = vpack.c.bf16 %v32_v24, %v31_v23  ;;  %v33_v27 = vld [vmem:[%s493_s2] sm:$0xff]  ;;  %v34_v31 = vld [vmem:[%s493_s2 + $0x8] sm:$0xff]  ;;  %s191_s2 = sshll.u32 %s356_s0, 4  ;;  %s192_s2 = int_to_ptr.vmem [resolvable:$true] %s191_s2 }
   0xc   :  { %s332_s24 = scalar_lea.vmem %s192_s2, 256  ;;  %p337_p1 = scmp.lt.s32.totalorder %s192_s2, %s192_s2 }
   0xd   :  { %284 = vmatpush3.bf16.xpose.msk.msra.mxu0 %vm390_vm1, %v279_v6  ;;  %p333_p0 = scmp.ne.s32.totalorder %s192_s2, %s332_s24  ;;  %p338_p2 = scmp.lt.s32.totalorder %s332_s24, %s332_s24 }
   0xe   :  { %287 = vmatprep.subr.msk.bf16.mxu0 %vm390_vm1, %v285_v10 }
   0xf   :  { %p339_p3 = por %p338_p2, %p337_p1 }
  0x11   :  { %p340_p4 = pnand %p339_p3, %p333_p0 }
  0x15   :  { %290 = vmatpush3.bf16.xpose.msk.msra.mxu0 %vm390_vm1, %v285_v10 }
  0x16   :  { %293 = vmatprep.subr.msk.bf16.mxu0 %vm390_vm1, %v291_v13 }
  0x1d   :  { %296 = vmatpush3.bf16.xpose.msk.msra.mxu0 %vm390_vm1, %v291_v13 }
  0x1e   :  { %299 = vmatprep.subr.msk.bf16.mxu0 %vm390_vm1, %v297_v16 }
  0x25   :  { %302 = vmatpush3.bf16.xpose.msk.msra.mxu0 %vm390_vm1, %v297_v16 }
  0x26   :  { %305 = vmatprep.subr.msk.bf16.mxu0 %vm390_vm1, %v303_v19 }
  0x2d   :  { %308 = vmatpush3.bf16.xpose.msk.msra.mxu0 %vm390_vm1, %v303_v19 }
  0x2e   :  { %311 = vmatprep.subr.msk.bf16.mxu0 %vm390_vm1, %v309_v22 }
  0x35   :  { %314 = vmatpush3.bf16.xpose.msk.msra.mxu0 %vm390_vm1, %v309_v22 }
  0x36   :  { %317 = vmatprep.subr.msk.bf16.mxu0 %vm390_vm1, %v315_v25 }
  0x3d   :  { %320 = vmatpush3.bf16.xpose.msk.msra.mxu0 %vm390_vm1, %v315_v25 }
  0x44   :  { %271 = vmatmul.mubr.msk.f32.vlgmr.msra.gmra.mrb[0].mxu0 %vm35_vm0, %v16_v26 }
 0x117   :  { %v272_v28 = vpop.f32.mrb[0].mxu0 }
 0x118   :  { %v156_v29 = vpop.f32.mrb[1].mxu0  ;;  %v162_v32 = vadd.f32 %v272_v28, %v34_v31 }
 0x119   :  { %v157_v30 = vadd.f32 %v156_v29, %v33_v27 }
 0x11b   :  { %165 = vmax.xlane.f32.xlu0 %v157_v30 }
 0x11f   :  { %167 = vmax.xlane.f32.xlu0 %v162_v32 }
 0x1a8   :  { %v166_v33 = vpop.xlane.xlu0 %165 }
 0x1a9   :  { %v169_v34 = vsub.f32 %v157_v30, %v166_v33 }
 0x1ab   :  { %v171_v35 = vmul.f32 1.442695, %v169_v34 }
 0x1ac   :  { %v168_v36 = vpop.xlane.xlu0 %167 }
 0x1ad   :  { %324 = vpow2.f32 %v171_v35  ;;  %v170_v37 = vsub.f32 %v162_v32, %v168_v36 }
 0x1af   :  { %v173_v38 = vmul.f32 1.442695, %v170_v37 }
 0x1b1   :  { %326 = vpow2.f32 %v173_v38 }
 0x1b7   :  { %v325_v39 = vpop.eup %324 }
 0x1b8   :  { %175 = vadd.xlane.f32.xlu1 %v325_v39 }
 0x1bb   :  { %v327_v40 = vpop.eup %326 }
 0x1bc   :  { %177 = vadd.xlane.f32.xlu1 %v327_v40 }
 0x245   :  { %v176_v41 = vpop.xlane.xlu1 %175 }
 0x246   :  { %328 = vrcp.f32 %v176_v41 }
 0x249   :  { %v178_v42 = vpop.xlane.xlu1 %177 }
 0x24a   :  { %330 = vrcp.f32 %v178_v42 }
 0x250   :  { %v329_v43 = vpop.eup %328 }
 0x251   :  { %v181_v44 = vmul.f32 %v329_v43, %v325_v39 }
 0x253   :  { %184 = vst.msk [vmem:[#allocation2] sm:$0xff] %vm183_vm2, %v181_v44 }
 0x254   :  { %v331_v45 = vpop.eup %330 }
 0x255   :  { %v182_v46 = vmul.f32 %v331_v45, %v327_v40 }
 0x257   :  { %185 = vst.msk [vmem:[#allocation2 + $0x8] sm:$0xff] %vm183_vm2, %v182_v46 }
 0x258   :  { %343 = shalt.err (!%p340_p4)
}
 0x259   :  { %s344_s27 = scalar_lea.hbm %s494_s3, 256 }
 0x25a   :  { %p345_p5 = scmp.ne.s32.totalorder %s494_s3, %s344_s27  ;;  %p348_p6 = scmp.lt.u32.totalorder %s344_s27, %s494_s3 }
 0x25c   :  { %p350_p7 = pnand %p348_p6, %p345_p5 }
 0x25e   :  { %353 = shalt.err (!%p350_p7)
}
 0x25f   :  { %s357_s5 = smov 128   ;;  %s358_s6 = smov 8  }
 0x260   :  { %197 = dma.vmem_to_hbm [thread:$0]  %s192_s2, 256, %s494_s3, [#allocation3], %s357_s5, %s357_s5, %s358_s6  }
 0x261   :  { %354 = dma.done.wait [#allocation3], 256  }
 0x262   :  { %355 = vsyncadd [#allocation3], 4294967040 }
 0x263   :  { %201 = vsyncpa [#allocation3], 1 }

</bundles_post_ra>
